<compile_context>
chip_gen: v5e
topology: v5e:2x2
jax: 0.10.0
libtpu: 0.0.40
codegen_flags: <defaults>
</compile_context>

<pallas_src>
import jax
import jax.numpy as jnp
from jax.experimental import pallas as pl
from jax.experimental.pallas import tpu as pltpu

IN_DIM = 28 * 28   # 784
HID_DIM = 3


def autoencoder_kernel(x_ref, w1_ref, b1_ref, w2t_ref, b2_ref, enc_t_ref, dec_ref):
    b1 = b1_ref[...]                                             # (1, 3)
    # Decoder accumulator lives directly in the dec output pipeline buffer.
    dec_ref[...] = jnp.broadcast_to(b2_ref[...], dec_ref.shape).astype(dec_ref.dtype)

    cols = []
    for j in range(HID_DIM):                                     # unrolled, HID_DIM == 3
        # Encoder: h_j = <x, w1[j]> + b1[j] -> VPU broadcast-multiply + XLU lane reduction in
        # true f32 (an N=3 f32 MXU matmul would be ~2% utilized and can exceed the per-step
        # DMA window on v7x).
        h_j = jnp.sum(x_ref[...] * w1_ref[j:j + 1, :], axis=-1, keepdims=True) + b1[:, j:j + 1]
        e_j = jnp.tanh(h_j)                                      # (TB, 1), tanh on the EUP
        cols.append(e_j)
        # Decoder: K=3 contraction as a broadcast-FMA on the VPU.
        dec_ref[...] += (e_j * w2t_ref[j:j + 1, :]).astype(dec_ref.dtype)

    dec_ref[...] = jnp.maximum(dec_ref[...], 0.0)                # ReLU on the VPU
    # enc written lane-dense (transposed): 3 contiguous TB*4-byte writebacks per grid step
    # instead of TB masked 12-byte stores.
    enc_t_ref[...] = jnp.transpose(jnp.concatenate(cols, axis=-1)).astype(enc_t_ref.dtype)


def autoencoder_forward(x, w1, b1, w2t, b2, *, block_rows=1024, out_dtype=jnp.float32):
    """Returns (enc, dec) = (tanh(x @ w1.T + b1), relu(enc @ w2t + b2))."""
    B = x.shape[0]
    assert x.shape == (B, IN_DIM)
    assert w1.shape == (HID_DIM, IN_DIM) and w2t.shape == (HID_DIM, IN_DIM)
    assert b1.shape == (1, HID_DIM) and b2.shape == (1, IN_DIM)

    # Tile the batch.  A single-step grid uses the sublane-rounded batch directly; multi-step
    # grids force TB to a multiple of 128 so the transposed-enc block (3, TB) is lane-aligned.
    B8 = ((B + 7) // 8) * 8
    if B8 <= block_rows:
        TB = B8
    else:
        TB = max(128, (block_rows // 128) * 128)
    B_pad = ((B + TB - 1) // TB) * TB
    if B_pad != B:
        x = jnp.pad(x, ((0, B_pad - B), (0, 0)))
    grid = (B_pad // TB,)

    def resident(arr):  # weights/biases: whole array, VMEM-resident across grid steps
        return pl.BlockSpec(arr.shape, lambda i: (0,) * arr.ndim)

    dec_itemsize = jnp.dtype(out_dtype).itemsize
    cost = pl.CostEstimate(
        flops=4 * B_pad * IN_DIM * HID_DIM,                    # encoder + decoder MACs
        transcendentals=B_pad * HID_DIM,                       # tanh
        bytes_accessed=int(B_pad * IN_DIM * 4                  # read x
                           + B_pad * IN_DIM * dec_itemsize     # write dec
                           + B_pad * HID_DIM * 4               # write enc
                           + (2 * HID_DIM * IN_DIM + IN_DIM + HID_DIM) * 4),  # params
    )

    enc_t, dec = pl.pallas_call(
        autoencoder_kernel,
        out_shape=(
            jax.ShapeDtypeStruct((HID_DIM, B_pad), jnp.float32),   # enc, stored lane-dense
            jax.ShapeDtypeStruct((B_pad, IN_DIM), out_dtype),
        ),
        grid=grid,
        in_specs=[
            pl.BlockSpec((TB, IN_DIM), lambda i: (i, 0)),          # x: tiled over batch
            resident(w1),
            resident(b1),
            resident(w2t),
            resident(b2),
        ],
        out_specs=(
            pl.BlockSpec((HID_DIM, TB), lambda i: (0, i)),
            pl.BlockSpec((TB, IN_DIM), lambda i: (i, 0)),
        ),
        compiler_params=pltpu.CompilerParams(
            dimension_semantics=("parallel",),     # megacore sharding of the batch axis (v7x)
            vmem_limit_bytes=32 * 1024 * 1024,     # v5e's 16 MiB default is too small at TB=1024
        ),
        cost_estimate=cost,
    )(x, w1, b1, w2t, b2)

    enc = jnp.transpose(enc_t)[:B]   # (B, 3); padded rows (nonzero garbage) are sliced off
    dec = dec[:B]
    return enc, dec


def init_params(key):
    # PyTorch nn.Linear default init: U(-1/sqrt(fan_in), 1/sqrt(fan_in)), stored kernel-layout.
    k1, k2, k3, k4 = jax.random.split(key, 4)
    bound1 = 1.0 / jnp.sqrt(IN_DIM)      # encoder fan_in = 784
    bound2 = 1.0 / jnp.sqrt(HID_DIM)     # decoder fan_in = 3
    w1 = jax.random.uniform(k1, (HID_DIM, IN_DIM), jnp.float32, -bound1, bound1)   # encoder.weight
    b1 = jax.random.uniform(k2, (1, HID_DIM), jnp.float32, -bound1, bound1)
    w2t = jax.random.uniform(k3, (HID_DIM, IN_DIM), jnp.float32, -bound2, bound2)  # decoder.weight.T
    b2 = jax.random.uniform(k4, (1, IN_DIM), jnp.float32, -bound2, bound2)
    return w1, b1, w2t, b2


def reference_forward(x, w1, b1, w2t, b2):
    # precision=HIGHEST: the kernel computes the encoder reduction in true f32, whereas TPU's
    # default matmul precision would silently truncate the reference to bf16.
    hi = jax.lax.Precision.HIGHEST
    enc = jnp.tanh(jnp.dot(x, w1.T, precision=hi) + b1)
    dec = jnp.maximum(jnp.dot(enc, w2t, precision=hi) + b2, 0.0)
    return enc, dec


if __name__ == "__main__":
    key = jax.random.PRNGKey(0)
    kx, kp = jax.random.split(key)
    w1, b1, w2t, b2 = init_params(kp)

    # Small single-step case (B=8 flattened 28x28 "images" in [0,1)).
    B = 8
    x = jax.random.uniform(kx, (B, IN_DIM), jnp.float32)
    enc, dec = autoencoder_forward(x, w1, b1, w2t, b2)
    jax.block_until_ready((enc, dec))
    enc_ref, dec_ref = reference_forward(x, w1, b1, w2t, b2)
    assert enc.shape == (B, HID_DIM) and dec.shape == (B, IN_DIM)
    assert jnp.allclose(enc, enc_ref, atol=1e-5, rtol=1e-5)
    assert jnp.allclose(dec, dec_ref, atol=1e-5, rtol=1e-5)

    # Multi-step pipelined path (2 grid steps, VMEM-resident weights, ragged-batch padding,
    # lane-dense transposed enc writeback).
    B2 = 200
    x2 = jax.random.uniform(jax.random.PRNGKey(1), (B2, IN_DIM), jnp.float32)
    enc2, dec2 = autoencoder_forward(x2, w1, b1, w2t, b2, block_rows=128)
    jax.block_until_ready((enc2, dec2))
    enc2_ref, dec2_ref = reference_forward(x2, w1, b1, w2t, b2)
    assert enc2.shape == (B2, HID_DIM) and dec2.shape == (B2, IN_DIM)
    assert jnp.allclose(enc2, enc2_ref, atol=1e-5, rtol=1e-5)
    assert jnp.allclose(dec2, dec2_ref, atol=1e-5, rtol=1e-5)

    print("KERNEL_OK")
</pallas_src>

<mosaic_0001>
module attributes {stable_mosaic.version = 11 : i64} {
  func.func @autoencoder_kernel(%arg0: i32, %arg1: memref<8x784xf32, #tpu.memory_space<vmem>>, %arg2: memref<3x784xf32, #tpu.memory_space<vmem>>, %arg3: memref<1x3xf32, #tpu.memory_space<vmem>>, %arg4: memref<3x784xf32, #tpu.memory_space<vmem>>, %arg5: memref<1x784xf32, #tpu.memory_space<vmem>>, %arg6: memref<3x8xf32, #tpu.memory_space<vmem>>, %arg7: memref<8x784xf32, #tpu.memory_space<vmem>>) attributes {dimension_semantics = [#tpu.dimension_semantics<parallel>], iteration_bounds = array<i64: 1>, scalar_prefetch = 0 : i64, scratch_operands = 0 : i64, tpu.core_type = #tpu.core_type<tc>, window_params = [{transform_indices = @transform_0, window_bounds = array<i64: 8, 784>}, {pipeline_mode = #tpu.pipeline_mode<synchronous>, transform_indices = @transform_1, window_bounds = array<i64: 3, 784>}, {pipeline_mode = #tpu.pipeline_mode<synchronous>, transform_indices = @transform_2, window_bounds = array<i64: 1, 3>}, {pipeline_mode = #tpu.pipeline_mode<synchronous>, transform_indices = @transform_3, window_bounds = array<i64: 3, 784>}, {pipeline_mode = #tpu.pipeline_mode<synchronous>, transform_indices = @transform_4, window_bounds = array<i64: 1, 784>}, {transform_indices = @transform_5, window_bounds = array<i64: 3, 8>}, {transform_indices = @transform_6, window_bounds = array<i64: 8, 784>}]} {
    %c0 = arith.constant 0 : index
    %c0_0 = arith.constant 0 : index
    %0 = vector.load %arg3[%c0, %c0_0] : memref<1x3xf32, #tpu.memory_space<vmem>>, vector<1x3xf32>
    %c0_1 = arith.constant 0 : index
    %c0_2 = arith.constant 0 : index
    %1 = vector.load %arg5[%c0_1, %c0_2] : memref<1x784xf32, #tpu.memory_space<vmem>>, vector<1x784xf32>
    %2 = vector.shape_cast %1 : vector<1x784xf32> to vector<1x784xf32>
    %3 = vector.broadcast %2 : vector<1x784xf32> to vector<8x784xf32>
    %c0_3 = arith.constant 0 : index
    %c0_4 = arith.constant 0 : index
    %4 = vector.load %arg7[%c0_3, %c0_4] : memref<8x784xf32, #tpu.memory_space<vmem>>, vector<8x784xf32>
    tpu.vector_store %arg7[%c0_3, %c0_4], %3 {strides = array<i32>} : memref<8x784xf32, #tpu.memory_space<vmem>>, vector<8x784xf32>,
    %c0_5 = arith.constant 0 : index
    %c0_6 = arith.constant 0 : index
    %5 = vector.load %arg1[%c0_5, %c0_6] : memref<8x784xf32, #tpu.memory_space<vmem>>, vector<8x784xf32>
    %c0_7 = arith.constant 0 : index
    %c0_8 = arith.constant 0 : index
    %6 = vector.load %arg2[%c0_7, %c0_8] : memref<3x784xf32, #tpu.memory_space<vmem>>, vector<1x784xf32>
    %7 = vector.broadcast %6 : vector<1x784xf32> to vector<8x784xf32>
    %8 = arith.mulf %5, %7 : vector<8x784xf32>
    %cst = arith.constant dense<0.000000e+00> : vector<8xf32>
    %9 = vector.multi_reduction <add>, %8, %cst [1] : vector<8x784xf32> to vector<8xf32>
    %10 = vector.shape_cast %9 : vector<8xf32> to vector<8x1xf32>
    %11 = vector.extract_strided_slice %0 {offsets = [0, 0], sizes = [1, 1], strides = [1, 1]} : vector<1x3xf32> to vector<1x1xf32>
    %12 = vector.broadcast %11 : vector<1x1xf32> to vector<8x1xf32>
    %13 = arith.addf %10, %12 : vector<8x1xf32>
    %14 = math.tanh %13 : vector<8x1xf32>
    %c0_9 = arith.constant 0 : index
    %c0_10 = arith.constant 0 : index
    %15 = vector.load %arg7[%c0_9, %c0_10] : memref<8x784xf32, #tpu.memory_space<vmem>>, vector<8x784xf32>
    %c0_11 = arith.constant 0 : index
    %c0_12 = arith.constant 0 : index
    %16 = vector.load %arg4[%c0_11, %c0_12] : memref<3x784xf32, #tpu.memory_space<vmem>>, vector<1x784xf32>
    %17 = vector.broadcast %14 : vector<8x1xf32> to vector<8x784xf32>
    %18 = vector.broadcast %16 : vector<1x784xf32> to vector<8x784xf32>
    %19 = arith.mulf %17, %18 : vector<8x784xf32>
    %20 = arith.addf %15, %19 : vector<8x784xf32>
    %c0_13 = arith.constant 0 : index
    %c0_14 = arith.constant 0 : index
    %21 = vector.load %arg7[%c0_13, %c0_14] : memref<8x784xf32, #tpu.memory_space<vmem>>, vector<8x784xf32>
    tpu.vector_store %arg7[%c0_13, %c0_14], %20 {strides = array<i32>} : memref<8x784xf32, #tpu.memory_space<vmem>>, vector<8x784xf32>,
    %c0_15 = arith.constant 0 : index
    %c0_16 = arith.constant 0 : index
    %22 = vector.load %arg1[%c0_15, %c0_16] : memref<8x784xf32, #tpu.memory_space<vmem>>, vector<8x784xf32>
    %c1 = arith.constant 1 : index
    %c0_17 = arith.constant 0 : index
    %23 = vector.load %arg2[%c1, %c0_17] : memref<3x784xf32, #tpu.memory_space<vmem>>, vector<1x784xf32>
    %24 = vector.broadcast %23 : vector<1x784xf32> to vector<8x784xf32>
    %25 = arith.mulf %22, %24 : vector<8x784xf32>
    %cst_18 = arith.constant dense<0.000000e+00> : vector<8xf32>
    %26 = vector.multi_reduction <add>, %25, %cst_18 [1] : vector<8x784xf32> to vector<8xf32>
    %27 = vector.shape_cast %26 : vector<8xf32> to vector<8x1xf32>
    %28 = vector.extract_strided_slice %0 {offsets = [0, 1], sizes = [1, 1], strides = [1, 1]} : vector<1x3xf32> to vector<1x1xf32>
    %29 = vector.broadcast %28 : vector<1x1xf32> to vector<8x1xf32>
    %30 = arith.addf %27, %29 : vector<8x1xf32>
    %31 = math.tanh %30 : vector<8x1xf32>
    %c0_19 = arith.constant 0 : index
    %c0_20 = arith.constant 0 : index
    %32 = vector.load %arg7[%c0_19, %c0_20] : memref<8x784xf32, #tpu.memory_space<vmem>>, vector<8x784xf32>
    %c1_21 = arith.constant 1 : index
    %c0_22 = arith.constant 0 : index
    %33 = vector.load %arg4[%c1_21, %c0_22] : memref<3x784xf32, #tpu.memory_space<vmem>>, vector<1x784xf32>
    %34 = vector.broadcast %31 : vector<8x1xf32> to vector<8x784xf32>
    %35 = vector.broadcast %33 : vector<1x784xf32> to vector<8x784xf32>
    %36 = arith.mulf %34, %35 : vector<8x784xf32>
    %37 = arith.addf %32, %36 : vector<8x784xf32>
    %c0_23 = arith.constant 0 : index
    %c0_24 = arith.constant 0 : index
    %38 = vector.load %arg7[%c0_23, %c0_24] : memref<8x784xf32, #tpu.memory_space<vmem>>, vector<8x784xf32>
    tpu.vector_store %arg7[%c0_23, %c0_24], %37 {strides = array<i32>} : memref<8x784xf32, #tpu.memory_space<vmem>>, vector<8x784xf32>,
    %c0_25 = arith.constant 0 : index
    %c0_26 = arith.constant 0 : index
    %39 = vector.load %arg1[%c0_25, %c0_26] : memref<8x784xf32, #tpu.memory_space<vmem>>, vector<8x784xf32>
    %c2 = arith.constant 2 : index
    %c0_27 = arith.constant 0 : index
    %40 = vector.load %arg2[%c2, %c0_27] : memref<3x784xf32, #tpu.memory_space<vmem>>, vector<1x784xf32>
    %41 = vector.broadcast %40 : vector<1x784xf32> to vector<8x784xf32>
    %42 = arith.mulf %39, %41 : vector<8x784xf32>
    %cst_28 = arith.constant dense<0.000000e+00> : vector<8xf32>
    %43 = vector.multi_reduction <add>, %42, %cst_28 [1] : vector<8x784xf32> to vector<8xf32>
    %44 = vector.shape_cast %43 : vector<8xf32> to vector<8x1xf32>
    %45 = vector.extract_strided_slice %0 {offsets = [0, 2], sizes = [1, 1], strides = [1, 1]} : vector<1x3xf32> to vector<1x1xf32>
    %46 = vector.broadcast %45 : vector<1x1xf32> to vector<8x1xf32>
    %47 = arith.addf %44, %46 : vector<8x1xf32>
    %48 = math.tanh %47 : vector<8x1xf32>
    %c0_29 = arith.constant 0 : index
    %c0_30 = arith.constant 0 : index
    %49 = vector.load %arg7[%c0_29, %c0_30] : memref<8x784xf32, #tpu.memory_space<vmem>>, vector<8x784xf32>
    %c2_31 = arith.constant 2 : index
    %c0_32 = arith.constant 0 : index
    %50 = vector.load %arg4[%c2_31, %c0_32] : memref<3x784xf32, #tpu.memory_space<vmem>>, vector<1x784xf32>
    %51 = vector.broadcast %48 : vector<8x1xf32> to vector<8x784xf32>
    %52 = vector.broadcast %50 : vector<1x784xf32> to vector<8x784xf32>
    %53 = arith.mulf %51, %52 : vector<8x784xf32>
    %54 = arith.addf %49, %53 : vector<8x784xf32>
    %c0_33 = arith.constant 0 : index
    %c0_34 = arith.constant 0 : index
    %55 = vector.load %arg7[%c0_33, %c0_34] : memref<8x784xf32, #tpu.memory_space<vmem>>, vector<8x784xf32>
    tpu.vector_store %arg7[%c0_33, %c0_34], %54 {strides = array<i32>} : memref<8x784xf32, #tpu.memory_space<vmem>>, vector<8x784xf32>,
    %c0_35 = arith.constant 0 : index
    %c0_36 = arith.constant 0 : index
    %56 = vector.load %arg7[%c0_35, %c0_36] : memref<8x784xf32, #tpu.memory_space<vmem>>, vector<8x784xf32>
    %cst_37 = arith.constant 0.000000e+00 : f32
    %57 = vector.broadcast %cst_37 : f32 to vector<8x784xf32>
    %58 = arith.maximumf %56, %57 : vector<8x784xf32>
    %c0_38 = arith.constant 0 : index
    %c0_39 = arith.constant 0 : index
    %59 = vector.load %arg7[%c0_38, %c0_39] : memref<8x784xf32, #tpu.memory_space<vmem>>, vector<8x784xf32>
    tpu.vector_store %arg7[%c0_38, %c0_39], %58 {strides = array<i32>} : memref<8x784xf32, #tpu.memory_space<vmem>>, vector<8x784xf32>,
    %60 = tpu.concatenate %14, %31, %48 in 1 : vector<8x1xf32>, vector<8x1xf32>, vector<8x1xf32> -> vector<8x3xf32>
    %61 = tpu.transpose %60, [1, 0] : vector<8x3xf32> -> vector<3x8xf32>
    %c0_40 = arith.constant 0 : index
    %c0_41 = arith.constant 0 : index
    %62 = vector.load %arg6[%c0_40, %c0_41] : memref<3x8xf32, #tpu.memory_space<vmem>>, vector<3x8xf32>
    tpu.vector_store %arg6[%c0_40, %c0_41], %61 {strides = array<i32>} : memref<3x8xf32, #tpu.memory_space<vmem>>, vector<3x8xf32>,
    return
  }
  func.func @transform_0(%arg0: i32) -> (i32, i32) {
    %c0_i32 = arith.constant 0 : i32
    %c0_i32_0 = arith.constant 0 : i32
    return %arg0, %c0_i32 : i32, i32
  }
  func.func @transform_1(%arg0: i32) -> (i32, i32) {
    %c0_i32 = arith.constant 0 : i32
    %c0_i32_0 = arith.constant 0 : i32
    %c0_i32_1 = arith.constant 0 : i32
    return %c0_i32, %c0_i32_0 : i32, i32
  }
  func.func @transform_2(%arg0: i32) -> (i32, i32) {
    %c0_i32 = arith.constant 0 : i32
    %c0_i32_0 = arith.constant 0 : i32
    %c0_i32_1 = arith.constant 0 : i32
    return %c0_i32, %c0_i32_0 : i32, i32
  }
  func.func @transform_3(%arg0: i32) -> (i32, i32) {
    %c0_i32 = arith.constant 0 : i32
    %c0_i32_0 = arith.constant 0 : i32
    %c0_i32_1 = arith.constant 0 : i32
    return %c0_i32, %c0_i32_0 : i32, i32
  }
  func.func @transform_4(%arg0: i32) -> (i32, i32) {
    %c0_i32 = arith.constant 0 : i32
    %c0_i32_0 = arith.constant 0 : i32
    %c0_i32_1 = arith.constant 0 : i32
    return %c0_i32, %c0_i32_0 : i32, i32
  }
  func.func @transform_5(%arg0: i32) -> (i32, i32) {
    %c0_i32 = arith.constant 0 : i32
    %c0_i32_0 = arith.constant 0 : i32
    return %c0_i32, %arg0 : i32, i32
  }
  func.func @transform_6(%arg0: i32) -> (i32, i32) {
    %c0_i32 = arith.constant 0 : i32
    %c0_i32_0 = arith.constant 0 : i32
    return %arg0, %c0_i32 : i32, i32
  }
}

</mosaic_0001>

<bundles_post_ra>
// kernel: tpu_custom_call.1
= control target key start
LH: loop header
LB: loop body
LE: loop exit
PB: predicated region body
PF: predicated region fallthrough
CT: control target
= control target key end

     0   :  { %12 = vsyncpa [#allocation3], 0  ;;  %s759_s0 = inlined_call_operand.hbm [shape: f32[8,784], index: 0, kind: input, shape index: {}]   ;;  %s760_s1 = inlined_call_operand.hbm [shape: f32[3,784], index: 1, kind: input, shape index: {}]   ;;  %s761_s2 = inlined_call_operand.vmem [shape: f32[1,3], index: 2, kind: input, shape index: {}]   ;;  %s762_s3 = inlined_call_operand.hbm [shape: f32[3,784], index: 3, kind: input, shape index: {}]   ;;  %s763_s4 = inlined_call_operand.hbm [shape: f32[1,784], index: 4, kind: input, shape index: {}]   ;;  %s764_s5 = inlined_call_operand.hbm [shape: f32[3,8], index: 5, kind: output, shape index: {0}]   ;;  %s765_s6 = inlined_call_operand.hbm [shape: f32[8,784], index: 6, kind: output, shape index: {1}]  }
   0x1   :  { %13 = vsyncpa [#allocation6], 0 }
   0x2   :  { %14 = vsyncpa [#allocation9], 0 }
   0x3   :  { %15 = vsyncpa [#allocation4], 0  ;;  %s33_s23 = sshll.u32 %s760_s1, 4  ;;  %s34_s23 = int_to_ptr.hbm [resolvable:$true] %s33_s23 }
   0x4   :  { %16 = vsyncpa [#allocation12], 0  ;;  %s650_s24 = smov [#allocation5]   ;;  %s22_s28 = sshll.u32 %s759_s0, 4  ;;  %s23_s28 = int_to_ptr.hbm [resolvable:$true] %s22_s28 }
   0x5   :  { %s35_s25 = sshll.u32 %s650_s24, 4  ;;  %s651_s29 = smov [#allocation2]   ;;  %s36_s25 = int_to_ptr.vmem [resolvable:$true] %s35_s25 }
   0x6   :  { %38 = dma.hbm_to_vmem [thread:$0]  %s34_s23, 448, %s36_s25, [#allocation6]  }
   0x7   :  { %s24_s30 = sshll.u32 %s651_s29, 4  ;;  %s46_s9 = sshll.u32 %s762_s3, 4  ;;  %s25_s30 = int_to_ptr.vmem [resolvable:$true] %s24_s30  ;;  %s47_s9 = int_to_ptr.hbm [resolvable:$true] %s46_s9 }
   0x8   :  { %27 = dma.hbm_to_vmem [thread:$0]  %s23_s28, 896, %s25_s30, [#allocation3]  }
   0x9   :  { %s57_s11 = sshll.u32 %s763_s4, 4  ;;  %s652_s12 = smov [#allocation7]   ;;  %s58_s11 = int_to_ptr.hbm [resolvable:$true] %s57_s11 }
   0xa   :  { %s48_s13 = sshll.u32 %s652_s12, 4  ;;  %s653_s0 = smov [#allocation8]   ;;  %s49_s13 = int_to_ptr.vmem [resolvable:$true] %s48_s13 }
   0xb   :  { %51 = dma.hbm_to_vmem [thread:$0]  %s47_s9, 448, %s49_s13, [#allocation6]  }
   0xc   :  { %s59_s14 = sshll.u32 %s653_s0, 4  ;;  %s60_s14 = int_to_ptr.vmem [resolvable:$true] %s59_s14 }
   0xd   :  { %62 = dma.hbm_to_vmem [thread:$0]  %s58_s11, 112, %s60_s14, [#allocation9]  }
   0xe   :  { %640 = dma.done.wait [#allocation3], 896  }
   0xf   :  { %641 = vsyncadd [#allocation3], 4294966400 }
  0x10   :  { %642 = dma.done.wait [#allocation6], 896  }
  0x11   :  { %643 = vsyncadd [#allocation6], 4294966400 }
  0x12   :  { %644 = dma.done.wait [#allocation9], 112  }
  0x13   :  { %645 = vsyncadd [#allocation9], 4294967184  ;;  %v104_v0 = vld [vmem:[#allocation2] sm:$0xff]  ;;  %v105_v1 = vld [vmem:[#allocation2 + $0x8] sm:$0xff]  ;;  %vm102_vm0 = vcmask 130048   ;;  %vm402_vm1 = vcmask 7168  }
  0x14   :  { %v106_v2 = vld [vmem:[#allocation2 + $0x10] sm:$0xff]  ;;  %v107_v4 = vld [vmem:[#allocation2 + $0x18] sm:$0xff]  ;;  %v108_v12 = vld [vmem:[#allocation2 + $0x20] sm:$0xff]  ;;  %vm404_vm2 = vcmask 15360   ;;  %s458_s18 = sshll.u32 %s765_s6, 4  ;;  %s658_s19 = smov [#allocation10]   ;;  %s459_s18 = int_to_ptr.hbm [resolvable:$true] %s458_s18 }
  0x15   :  { %v111_v3 = vld [vmem:[#allocation5] ss:$4 sm:$0x7f]  ;;  %v205_v11 = vld [vmem:[#allocation5 + $0x1] ss:$4 sm:$0x7f] }
  0x16   :  { %v113_v5 = vperm.slane %v111_v3, 0  ;;  %v114_v6 = vperm.slane %v111_v3, 1  ;;  %v115_v7 = vperm.slane %v111_v3, 2  ;;  %v116_v8 = vperm.slane %v111_v3, 3  ;;  %v110_v13 = vld [vmem:[#allocation2 + $0x30] sm:$0xff]  ;;  %v109_v20 = vld [vmem:[#allocation2 + $0x28] sm:$0xff] }
  0x17   :  { %v117_v9 = vperm.slane %v111_v3, 4  ;;  %v119_v10 = vperm.slane %v111_v3, 6  ;;  %v118_v17 = vperm.slane %v111_v3, 5  ;;  %v207_v19 = vperm.slane %v205_v11, 0  ;;  %s445_s20 = sshll.u32 %s658_s19, 4  ;;  %s447_s23 = sshll.u32 %s764_s5, 4  ;;  %s446_s20 = int_to_ptr.vmem [resolvable:$true] %s445_s20  ;;  %s448_s23 = int_to_ptr.hbm [resolvable:$true] %s447_s23 }
  0x18   :  { %v127_v14 = vmul.f32 %v113_v5, %v104_v0  ;;  %v128_v15 = vmul.f32 %v114_v6, %v105_v1  ;;  %v129_v16 = vmul.f32 %v115_v7, %v106_v2  ;;  %v130_v18 = vmul.f32 %v116_v8, %v107_v4  ;;  %v297_v28 = vld [vmem:[#allocation5 + $0x2] ss:$4 sm:$0x7f] }
  0x19   :  { %v208_v22 = vperm.slane %v205_v11, 1  ;;  %v209_v23 = vperm.slane %v205_v11, 2  ;;  %v210_v24 = vperm.slane %v205_v11, 3  ;;  %v131_v25 = vmul.f32 %v117_v9, %v108_v12 }
  0x1a   :  { %v134_v21 = vadd.f32 %v128_v15, %v127_v14  ;;  %v133_v26 = vmul.f32 %v119_v10, %v110_v13  ;;  %v211_v27 = vperm.slane %v205_v11, 4  ;;  %v221_v30 = vmul.f32 %v207_v19, %v104_v0 }
  0x1b   :  { %v222_v31 = vmul.f32 %v208_v22, %v105_v1  ;;  %v223_v32 = vmul.f32 %v209_v23, %v106_v2  ;;  %v132_v33 = vmul.f32 %v118_v17, %v109_v20  ;;  %v212_v34 = vperm.slane %v205_v11, 5 }
  0x1c   :  { %v135_v29 = vadd.f32 %v134_v21, %v129_v16  ;;  %v224_v35 = vmul.f32 %v210_v24, %v107_v4  ;;  %v299_v38 = vperm.slane %v297_v28, 0  ;;  %v300_v39 = vperm.slane %v297_v28, 1  ;;  %v80_v24 = vld [vmem:[#allocation8] sm:$0x7f] }
  0x1d   :  { %v228_v37 = vadd.f32 %v222_v31, %v221_v30  ;;  %v213_v40 = vperm.slane %v205_v11, 6  ;;  %v301_v41 = vperm.slane %v297_v28, 2  ;;  %v302_v42 = vperm.slane %v297_v28, 3  ;;  %v489_v11 = vld [vmem:[%s761_s2] ss:$0 sm:$0xff]  ;;  %s657_s2 = smov [#allocation11]  }
  0x1e   :  { %v136_v36 = vadd.f32 %v135_v29, %v130_v18  ;;  %v139_v44 = vsel %vm102_vm0, %v133_v26, 0.0  ;;  %v225_v45 = vmul.f32 %v211_v27, %v108_v12  ;;  %v303_v47 = vperm.slane %v297_v28, 4  ;;  %v715_v27 = vld [vmem:[#allocation7 + $0x1] ss:$4 sm:$0x7f]  ;;  %s456_s15 = sshll.u32 %s657_s2, 4  ;;  %s457_s15 = int_to_ptr.vmem [resolvable:$true] %s456_s15 }
  0x1f   :  { %v229_v46 = vadd.f32 %v228_v37, %v223_v32  ;;  %v313_v48 = vmul.f32 %v299_v38, %v104_v0  ;;  %v314_v49 = vmul.f32 %v300_v39, %v105_v1  ;;  %v315_v50 = vmul.f32 %v301_v41, %v106_v2  ;;  %v155_v38 = vld [vmem:[#allocation7] ss:$4 sm:$0x7f] }
  0x20   :  { %v137_v43 = vadd.f32 %v136_v36, %v131_v25  ;;  %v226_v52 = vmul.f32 %v212_v34, %v109_v20  ;;  %v305_v54 = vperm.slane %v297_v28, 6  ;;  %v227_v55 = vmul.f32 %v213_v40, %v110_v13 }
  0x21   :  { %v230_v53 = vadd.f32 %v229_v46, %v224_v35  ;;  %v304_v56 = vperm.slane %v297_v28, 5  ;;  %v316_v57 = vmul.f32 %v302_v42, %v107_v4  ;;  %v320_v58 = vadd.f32 %v314_v49, %v313_v48  ;;  %v717_v28 = vld [vmem:[#allocation7 + $0x2] ss:$4 sm:$0x7f] }
  0x22   :  { %v138_v51 = vadd.f32 %v137_v43, %v132_v33  ;;  %v317_v61 = vmul.f32 %v303_v47, %v108_v12  ;;  %v319_v3 = vmul.f32 %v305_v54, %v110_v13  ;;  %v233_v5 = vsel %vm102_vm0, %v227_v55, 0.0 }
  0x23   :  { %v231_v60 = vadd.f32 %v230_v53, %v225_v45  ;;  %v321_v62 = vadd.f32 %v320_v58, %v315_v50  ;;  %v318_v0 = vmul.f32 %v304_v56, %v109_v20  ;;  %v654_v4 = vmov 0  }
  0x24   :  { %v140_v59 = vadd.f32 %v139_v44, %v138_v51  ;;  %v325_v7 = vsel %vm102_vm0, %v319_v3, 0.0  ;;  %485 = vset.pattern.permute.xlu1 %v654_v4  ;;  %v655_v10 = vmov 1   ;;  %v656_v23 = vmov 2  }
  0x25   :  { %v232_v63 = vadd.f32 %v231_v60, %v226_v52  ;;  %v322_v1 = vadd.f32 %v321_v62, %v316_v57  ;;  %486 = vset.pattern.permute.xlu2 %v655_v10  ;;  %v88_v25 = vperm.slane %v80_v24, 6  ;;  %v254_v29 = vperm.slane %v715_v27, 0 }
  0x26   :  { %141 = vadd.xlane.f32.xlu0 %v140_v59  ;;  %v255_v30 = vperm.slane %v715_v27, 1  ;;  %v256_v31 = vperm.slane %v715_v27, 2  ;;  %v257_v32 = vperm.slane %v715_v27, 3  ;;  %v258_v33 = vperm.slane %v715_v27, 4 }
  0x27   :  { %v323_v2 = vadd.f32 %v322_v1, %v317_v61  ;;  %v234_v6 = vadd.f32 %v233_v5, %v232_v63  ;;  %103 = vst.msk [vmem:[#allocation11 + $0x30] sm:$0xff] %vm102_vm0, %v88_v25  ;;  %v259_v34 = vperm.slane %v715_v27, 5  ;;  %v346_v35 = vperm.slane %v717_v28, 0 }
  0x28   :  { %v347_v36 = vperm.slane %v717_v28, 1  ;;  %v348_v37 = vperm.slane %v717_v28, 2  ;;  %v349_v39 = vperm.slane %v717_v28, 3  ;;  %v350_v40 = vperm.slane %v717_v28, 4 }
  0x29   :  { %v324_v8 = vadd.f32 %v323_v2, %v318_v0  ;;  %v351_v41 = vperm.slane %v717_v28, 5  ;;  %v82_v42 = vperm.slane %v80_v24, 0  ;;  %v83_v43 = vperm.slane %v80_v24, 1 }
  0x2a   :  { %v84_v44 = vperm.slane %v80_v24, 2  ;;  %v85_v45 = vperm.slane %v80_v24, 3  ;;  %v86_v46 = vperm.slane %v80_v24, 4  ;;  %v162_v48 = vperm.slane %v155_v38, 0 }
  0x2b   :  { %v326_v9 = vadd.f32 %v325_v7, %v324_v8  ;;  %v163_v49 = vperm.slane %v155_v38, 1  ;;  %v164_v50 = vperm.slane %v155_v38, 2  ;;  %v165_v51 = vperm.slane %v155_v38, 3 }
  0x2c   :  { %v87_v52 = vperm.slane %v80_v24, 5  ;;  %v166_v53 = vperm.slane %v155_v38, 4  ;;  %v167_v54 = vperm.slane %v155_v38, 5  ;;  %v168_v55 = vperm.slane %v155_v38, 6 }
  0x2d   :  { %327 = vadd.xlane.f32.xlu1 %v326_v9  ;;  %vm438_vm3 = vcmask 59392  }
  0x2e   :  { %235 = vadd.xlane.f32.xlu0 %v234_v6  ;;  %v154_v5 = vld [vmem:[#allocation11 + $0x30] sm:$0xff] }
  0x99   :  { %v142_v12 = vpop.xlane.xlu0 %141 }
  0x9a   :  { %v146_v13 = vadd.f32 %v489_v11, %v142_v12 }
  0x9c   :  { %490 = vtanh.f32 %v146_v13 }
  0xa0   :  { %v328_v17 = vpop.xlane.xlu1 %327 }
  0xa1   :  { %v236_v14 = vpop.xlane.xlu0 %235  ;;  %v329_v18 = vadd.f32 %v489_v11, %v328_v17 }
  0xa2   :  { %v491_v15 = vpop.eup %490  ;;  %v237_v16 = vadd.f32 %v489_v11, %v236_v14 }
  0xa3   :  { %158 = vperm.xlu1 %485, %v491_v15  }
  0xa4   :  { %492 = vtanh.f32 %v237_v16 }
  0xa5   :  { %494 = vtanh.f32 %v329_v18 }
  0xaa   :  { %v493_v19 = vpop.eup %492 }
  0xab   :  { %v495_v20 = vpop.eup %494  ;;  %250 = vperm.xlu2 %486, %v493_v19   ;;  %v403_v21 = vsel %vm402_vm1, %v491_v15, %v493_v19 }
  0xac   :  { %v405_v22 = vsel %vm404_vm2, %v403_v21, %v495_v20 }
  0xad   :  { %406 = vxpose.xlu0.b32.start.end [1/1] (short) (narrow) %v405_v22, 8 }
  0xb3   :  { %487 = vset.pattern.permute.xlu2 %v656_v23 }
  0xb4   :  { %342 = vperm.xlu2 %487, %v495_v20  }
 0x105   :  { %v713_v26 = vpop.permute.xlu2 %250 }
 0x106   :  { %v268_v56 = vmul.f32 %v254_v29, %v713_v26  ;;  %v269_v57 = vmul.f32 %v255_v30, %v713_v26  ;;  %v270_v58 = vmul.f32 %v256_v31, %v713_v26  ;;  %v271_v59 = vmul.f32 %v257_v32, %v713_v26 }
 0x107   :  { %v272_v60 = vmul.f32 %v258_v33, %v713_v26  ;;  %v273_v61 = vmul.f32 %v259_v34, %v713_v26  ;;  %v260_v33 = vperm.slane %v715_v27, 6  ;;  %v352_v27 = vperm.slane %v717_v28, 6 }
 0x10e   :  { %v731_v47 = vpop.permute.xlu2 %342 }
 0x10f   :  { %v360_v62 = vmul.f32 %v346_v35, %v731_v47  ;;  %v361_v63 = vmul.f32 %v347_v36, %v731_v47  ;;  %v362_v7 = vmul.f32 %v348_v37, %v731_v47  ;;  %v363_v14 = vmul.f32 %v349_v39, %v731_v47 }
 0x110   :  { %v364_v22 = vmul.f32 %v350_v40, %v731_v47  ;;  %v274_v40 = vmul.f32 %v260_v33, %v713_v26 }
 0x114   :  { %488 = vset.pattern.permute.xlu0 %v656_v23  ;;  %v365_v23 = vmul.f32 %v351_v41, %v731_v47 }
 0x115   :  { %v159_v3 = vpop.permute.xlu1 %158 }
 0x116   :  { %v176_v0 = vmul.f32 %v162_v48, %v159_v3  ;;  %v177_v1 = vmul.f32 %v163_v49, %v159_v3  ;;  %v178_v2 = vmul.f32 %v164_v50, %v159_v3  ;;  %v179_v6 = vmul.f32 %v165_v51, %v159_v3 }
 0x117   :  { %v180_v8 = vmul.f32 %v166_v53, %v159_v3  ;;  %v181_v9 = vmul.f32 %v167_v54, %v159_v3  ;;  %v182_v4 = vmul.f32 %v168_v55, %v159_v3 }
 0x118   :  { %v183_v10 = vadd.f32 %v176_v0, %v82_v42  ;;  %v184_v11 = vadd.f32 %v177_v1, %v83_v43  ;;  %v185_v12 = vadd.f32 %v178_v2, %v84_v44  ;;  %v186_v13 = vadd.f32 %v179_v6, %v85_v45 }
 0x119   :  { %v187_v15 = vadd.f32 %v180_v8, %v86_v46  ;;  %v188_v16 = vadd.f32 %v181_v9, %v87_v52  ;;  %v189_v17 = vadd.f32 %v182_v4, %v154_v5  ;;  %v366_v45 = vmul.f32 %v352_v27, %v731_v47 }
 0x11a   :  { %v275_v18 = vadd.f32 %v268_v56, %v183_v10  ;;  %v276_v19 = vadd.f32 %v269_v57, %v184_v11  ;;  %v277_v20 = vadd.f32 %v270_v58, %v185_v12  ;;  %v278_v21 = vadd.f32 %v271_v59, %v186_v13 }
 0x11b   :  { %196 = vst.msk [vmem:[#allocation11 + $0x30] sm:$0xff] %vm102_vm0, %v189_v17  ;;  %v279_v24 = vadd.f32 %v272_v60, %v187_v15  ;;  %v280_v25 = vadd.f32 %v273_v61, %v188_v16 }
 0x11c   :  { %v367_v29 = vadd.f32 %v360_v62, %v275_v18  ;;  %v368_v30 = vadd.f32 %v361_v63, %v276_v19  ;;  %v369_v31 = vadd.f32 %v362_v7, %v277_v20  ;;  %v370_v32 = vadd.f32 %v363_v14, %v278_v21 }
 0x11d   :  { %v371_v34 = vadd.f32 %v364_v22, %v279_v24  ;;  %v372_v35 = vadd.f32 %v365_v23, %v280_v25 }
 0x11e   :  { %v388_v36 = vmax.f32 %v367_v29, 0.0  ;;  %v389_v37 = vmax.f32 %v368_v30, 0.0  ;;  %v390_v38 = vmax.f32 %v369_v31, 0.0  ;;  %v391_v39 = vmax.f32 %v370_v32, 0.0 }
 0x11f   :  { %v392_v42 = vmax.f32 %v371_v34, 0.0  ;;  %v393_v43 = vmax.f32 %v372_v35, 0.0 }
 0x120   :  { %395 = vst [vmem:[#allocation11] sm:$0xff] %v388_v36 }
 0x121   :  { %396 = vst [vmem:[#allocation11 + $0x8] sm:$0xff] %v389_v37 }
 0x122   :  { %v245_v41 = vld [vmem:[#allocation11 + $0x30] sm:$0xff]  ;;  %397 = vst [vmem:[#allocation11 + $0x10] sm:$0xff] %v390_v38 }
 0x123   :  { %v281_v44 = vadd.f32 %v274_v40, %v245_v41  ;;  %398 = vst [vmem:[#allocation11 + $0x18] sm:$0xff] %v391_v39 }
 0x124   :  { %399 = vst [vmem:[#allocation11 + $0x20] sm:$0xff] %v392_v42 }
 0x125   :  { %288 = vst.msk [vmem:[#allocation11 + $0x30] sm:$0xff] %vm102_vm0, %v281_v44 }
 0x126   :  { %400 = vst [vmem:[#allocation11 + $0x28] sm:$0xff] %v393_v43 }
 0x12c   :  { %v337_v46 = vld [vmem:[#allocation11 + $0x30] sm:$0xff] }
 0x12d   :  { %v373_v48 = vadd.f32 %v366_v45, %v337_v46 }
 0x12f   :  { %380 = vst.msk [vmem:[#allocation11 + $0x30] sm:$0xff] %vm102_vm0, %v373_v48 }
 0x136   :  { %v387_v26 = vld [vmem:[#allocation11 + $0x30] sm:$0xff] }
 0x137   :  { %v394_v49 = vmax.f32 %v387_v26, 0.0 }
 0x139   :  { %401 = vst.msk [vmem:[#allocation11 + $0x30] sm:$0xff] %vm102_vm0, %v394_v49 }
 0x13a   :  { %461 = dma.vmem_to_hbm [thread:$0]  %s457_s15, 896, %s459_s18, [#allocation12]  }
 0x151   :  { %v422_v28 = vpop.trf.xlu0 }
 0x152   :  { %439 = vst.msk [vmem:[#allocation10] sm:$0x7] %vm438_vm3, %v422_v28 }
 0x153   :  { %450 = dma.vmem_to_hbm [thread:$0]  %s446_s20, 64, %s448_s23, [#allocation4]  }
 0x154   :  { %646 = dma.done.wait [#allocation4], 64  }
 0x155   :  { %647 = vsyncadd [#allocation4], 4294967232 }
 0x156   :  { %648 = dma.done.wait [#allocation12], 896  }
 0x157   :  { %649 = vsyncadd [#allocation12], 4294966400 }
 0x158   :  { %470 = vsyncpa [#allocation3], 1 }
 0x159   :  { %471 = vsyncpa [#allocation6], 1 }
 0x15a   :  { %472 = vsyncpa [#allocation9], 1 }
 0x15b   :  { %473 = vsyncpa [#allocation4], 1 }
 0x15c   :  { %474 = vsyncpa [#allocation12], 1 }

</bundles_post_ra>
